<compile_context>
chip_gen: v5e
topology: v5e:2x2
jax: 0.10.0
libtpu: 0.0.40
codegen_flags: <defaults>
</compile_context>

<pallas_src>
import functools

import jax
import jax.numpy as jnp
from jax.experimental import pallas as pl
from jax.experimental.pallas import tpu as pltpu


# ---------------------------------------------------------------------------
# Kernels
# ---------------------------------------------------------------------------

def _instance_norm_fused_kernel(x_ref, scale_ref, shift_ref, o_ref, *, eps, n_true):
    # x_ref:     (1, c_tile, N_lane) VMEM   (N_lane = H*W padded to 128-multiple)
    # scale_ref: (c_tile, 1)         VMEM
    # shift_ref: (c_tile, 1)         VMEM
    # o_ref:     (1, c_tile, N_lane) VMEM
    x = x_ref[0].astype(jnp.float32)                       # (c_tile, N_lane)
    inv_n = 1.0 / float(n_true)                            # true N (zeros pad tail)

    s = jnp.sum(x, axis=1, keepdims=True)                  # (c_tile, 1)
    ss = jnp.sum(x * x, axis=1, keepdims=True)             # (c_tile, 1)
    mean = s * inv_n
    var = jnp.maximum(ss * inv_n - mean * mean, 0.0)       # biased variance
    inv_std = jax.lax.rsqrt(var + eps)                     # EUP, no divide

    gain = inv_std * scale_ref[...].astype(jnp.float32)    # fold scale into 1 mul
    bias = shift_ref[...].astype(jnp.float32) - mean * gain
    o_ref[0] = (x * gain + bias).astype(o_ref.dtype)


def _instance_norm_stats_kernel(x_ref, sum_ref, sq_ref):
    # Accumulate sum(x) / sum(x*x) across the N grid axis (resident output blocks).
    @pl.when(pl.program_id(2) == 0)
    def _init():
        sum_ref[...] = jnp.zeros_like(sum_ref)
        sq_ref[...] = jnp.zeros_like(sq_ref)

    x = x_ref[0].astype(jnp.float32)                       # (c_tile, n_tile)
    sum_ref[0] += jnp.sum(x, axis=1, keepdims=True)
    sq_ref[0] += jnp.sum(x * x, axis=1, keepdims=True)


def _instance_norm_apply_kernel(x_ref, gain_ref, bias_ref, o_ref):
    x = x_ref[0].astype(jnp.float32)                       # (c_tile, n_tile)
    o_ref[0] = (x * gain_ref[0] + bias_ref[0]).astype(o_ref.dtype)


# ---------------------------------------------------------------------------
# Tiling helpers
# ---------------------------------------------------------------------------

def _round_up(x, m):
    return ((x + m - 1) // m) * m


def _cdiv(a, b):
    return (a + b - 1) // b


def _sublane(itemsize):
    return {4: 8, 2: 16, 1: 32}.get(itemsize, 8)


def _vmem_limit_bytes(footprint, vmem_cap):
    """Scoped VMEM limit: pipeline footprint * 1.5 + headroom, capped at 3/4 cap."""
    hi = (vmem_cap * 3) // 4
    return int(max(16 << 20, min(int(footprint * 1.5) + (4 << 20), hi)))


# ---------------------------------------------------------------------------
# Wrapper
# ---------------------------------------------------------------------------

def instance_norm(x, scale, shift, eps=1e-9, block_bytes=None):
    """x: (B, C, H, W); scale, shift: (C,).  Returns (B, C, H, W)."""
    B, C, H, W = x.shape
    N = H * W
    itemsize = jnp.dtype(x.dtype).itemsize
    sub = _sublane(itemsize)

    try:
        vmem_cap = int(pltpu.get_tpu_info().vmem_capacity_bytes)
    except Exception:
        vmem_cap = 64 * 1024 * 1024  # be conservative (v7x per-core size)
    if block_bytes is None:
        # Bigger blocks where VMEM allows (v5e/v6e: 128 MiB; v7x: 64 MiB).
        block_bytes = (8 << 20) if vmem_cap >= (100 << 20) else (4 << 20)

    N_lane = _round_up(N, 128)          # lane-dense last dim (unmasked stores)
    x_flat = x.reshape(B, C, N)         # contiguous, free

    # ------------------------------------------------------------------
    # Fused single-pass path: a whole (c_tile, H*W) slab fits in one block.
    # ------------------------------------------------------------------
    if sub * N_lane * itemsize <= block_bytes:
        max_c = max(sub, (block_bytes // (N_lane * itemsize)) // sub * sub)
        c_tile = min(_round_up(C, sub), max_c)

        # Keep enough grid steps for megacore sharding / pipeline warm-up.
        while B * _cdiv(C, c_tile) < 8 and c_tile > sub:
            smaller = max(sub, _round_up(max(1, c_tile // 2), sub))
            if smaller == c_tile:
                break
            c_tile = smaller
        C_pad = _round_up(C, c_tile)

        if C_pad != C or N_lane != N:
            x_flat = jnp.pad(x_flat, ((0, 0), (0, C_pad - C), (0, N_lane - N)))
        scale_p = jnp.pad(scale, (0, C_pad - C)).reshape(C_pad, 1)
        shift_p = jnp.pad(shift, (0, C_pad - C)).reshape(C_pad, 1)

        block_in = c_tile * N_lane * itemsize
        # 2x double-buffered (in + out) + ~3 f32 block temporaries + tiny params.
        footprint = 4 * block_in + 3 * c_tile * N_lane * 4 + 8 * c_tile * 4

        out_flat = pl.pallas_call(
            functools.partial(_instance_norm_fused_kernel, eps=eps, n_true=N),
            out_shape=jax.ShapeDtypeStruct((B, C_pad, N_lane), x.dtype),
            grid=(C_pad // c_tile, B),   # B innermost -> scale/shift not re-DMAed
            in_specs=[
                pl.BlockSpec((1, c_tile, N_lane), lambda c, b: (b, c, 0)),
                pl.BlockSpec((c_tile, 1), lambda c, b: (c, 0)),
                pl.BlockSpec((c_tile, 1), lambda c, b: (c, 0)),
            ],
            out_specs=pl.BlockSpec((1, c_tile, N_lane), lambda c, b: (b, c, 0)),
            compiler_params=pltpu.CompilerParams(
                dimension_semantics=("parallel", "parallel"),
                vmem_limit_bytes=_vmem_limit_bytes(footprint, vmem_cap),
            ),
        )(x_flat, scale_p, shift_p)

        return out_flat[:, :C, :N].reshape(B, C, H, W)

    # ------------------------------------------------------------------
    # N-tiled path for large spatial sizes: stats pass + normalization pass.
    # ------------------------------------------------------------------
    c_tile = sub
    n_tile = min(N_lane, max(128, (block_bytes // (c_tile * itemsize)) // 128 * 128))
    N_pad = _round_up(N, n_tile)
    C_pad = _round_up(C, c_tile)

    if C_pad != C or N_pad != N:
        x_flat = jnp.pad(x_flat, ((0, 0), (0, C_pad - C), (0, N_pad - N)))

    grid = (C_pad // c_tile, B, N_pad // n_tile)
    block_in = c_tile * n_tile * itemsize

    stats_footprint = 2 * block_in + 2 * c_tile * n_tile * 4 + 16 * c_tile * 4
    sums, sqs = pl.pallas_call(
        _instance_norm_stats_kernel,
        out_shape=(
            jax.ShapeDtypeStruct((B, C_pad, 1), jnp.float32),
            jax.ShapeDtypeStruct((B, C_pad, 1), jnp.float32),
        ),
        grid=grid,
        in_specs=[pl.BlockSpec((1, c_tile, n_tile), lambda c, b, n: (b, c, n))],
        out_specs=(
            pl.BlockSpec((1, c_tile, 1), lambda c, b, n: (b, c, 0)),
            pl.BlockSpec((1, c_tile, 1), lambda c, b, n: (b, c, 0)),
        ),
        compiler_params=pltpu.CompilerParams(
            dimension_semantics=("parallel", "parallel", "arbitrary"),
            vmem_limit_bytes=_vmem_limit_bytes(stats_footprint, vmem_cap),
        ),
    )(x_flat)

    # Tiny (B, C) math: fold mean/var/scale/shift into per-channel gain/bias.
    inv_n = 1.0 / float(N)                                   # true N (zero padding)
    mean = sums[:, :, 0] * inv_n                             # (B, C_pad)
    var = jnp.maximum(sqs[:, :, 0] * inv_n - mean * mean, 0.0)
    inv_std = jax.lax.rsqrt(var + eps)
    scale_p = jnp.pad(scale.astype(jnp.float32), (0, C_pad - C))
    shift_p = jnp.pad(shift.astype(jnp.float32), (0, C_pad - C))
    gain = inv_std * scale_p[None, :]
    bias = shift_p[None, :] - mean * gain
    gain3 = gain[:, :, None]                                 # (B, C_pad, 1) f32
    bias3 = bias[:, :, None]

    apply_footprint = 4 * block_in + 2 * c_tile * n_tile * 4 + 16 * c_tile * 4
    out_flat = pl.pallas_call(
        _instance_norm_apply_kernel,
        out_shape=jax.ShapeDtypeStruct((B, C_pad, N_pad), x.dtype),
        grid=grid,
        in_specs=[
            pl.BlockSpec((1, c_tile, n_tile), lambda c, b, n: (b, c, n)),
            pl.BlockSpec((1, c_tile, 1), lambda c, b, n: (b, c, 0)),
            pl.BlockSpec((1, c_tile, 1), lambda c, b, n: (b, c, 0)),
        ],
        out_specs=pl.BlockSpec((1, c_tile, n_tile), lambda c, b, n: (b, c, n)),
        compiler_params=pltpu.CompilerParams(
            dimension_semantics=("parallel", "parallel", "parallel"),
            vmem_limit_bytes=_vmem_limit_bytes(apply_footprint, vmem_cap),
        ),
    )(x_flat, gain3, bias3)

    return out_flat[:, :C, :N].reshape(B, C, H, W)


# ---------------------------------------------------------------------------
# Pure-JAX reference (mirrors the PyTorch forward)
# ---------------------------------------------------------------------------

def instance_norm_ref(x, scale, shift, eps=1e-9):
    mean = jnp.mean(x, axis=(2, 3), keepdims=True)
    var = jnp.mean((x - mean) ** 2, axis=(2, 3), keepdims=True)  # biased
    out = (x - mean) / jnp.sqrt(var + eps)
    return out * scale.reshape(1, -1, 1, 1) + shift.reshape(1, -1, 1, 1)


if __name__ == "__main__":
    key = jax.random.PRNGKey(0)
    kx, ks = jax.random.split(key)

    B, C, H, W = 2, 4, 16, 16
    x = jax.random.normal(kx, (B, C, H, W), dtype=jnp.float32)
    # Match PyTorch init: scale ~ U(0, 1), shift = 0.
    scale = jax.random.uniform(ks, (C,), dtype=jnp.float32)
    shift = jnp.zeros((C,), dtype=jnp.float32)

    # 1) Fused single-pass path.
    out = jax.block_until_ready(instance_norm(x, scale, shift))
    ref = instance_norm_ref(x, scale, shift)
    assert out.shape == (B, C, H, W)
    assert jnp.allclose(out, ref, atol=1e-4, rtol=1e-4), "fused path mismatch"

    # 2) Padding path (C and H*W not aligned to sublane/lane multiples).
    kx2, ks2 = jax.random.split(jax.random.PRNGKey(1))
    x2 = jax.random.normal(kx2, (1, 3, 10, 10), dtype=jnp.float32)
    sc2 = jax.random.uniform(ks2, (3,), dtype=jnp.float32)
    sh2 = jnp.zeros((3,), dtype=jnp.float32)
    out2 = jax.block_until_ready(instance_norm(x2, sc2, sh2))
    ref2 = instance_norm_ref(x2, sc2, sh2)
    assert jnp.allclose(out2, ref2, atol=1e-4, rtol=1e-4), "padding path mismatch"

    # 3) N-tiled (large-image) path, exercised by forcing a tiny block budget.
    out3 = jax.block_until_ready(instance_norm(x, scale, shift, block_bytes=4096))
    assert jnp.allclose(out3, ref, atol=1e-4, rtol=1e-4), "tiled path mismatch"

    print("KERNEL_OK")
</pallas_src>

<mosaic_0001>
module attributes {stable_mosaic.version = 11 : i64} {
  func.func @_instance_norm_fused_kernel(%arg0: i32, %arg1: i32, %arg2: memref<1x8x256xf32, #tpu.memory_space<vmem>>, %arg3: memref<8x1xf32, #tpu.memory_space<vmem>>, %arg4: memref<8x1xf32, #tpu.memory_space<vmem>>, %arg5: memref<1x8x256xf32, #tpu.memory_space<vmem>>) attributes {dimension_semantics = [#tpu.dimension_semantics<parallel>, #tpu.dimension_semantics<parallel>], iteration_bounds = array<i64: 1, 2>, scalar_prefetch = 0 : i64, scratch_operands = 0 : i64, tpu.core_type = #tpu.core_type<tc>, window_params = [{transform_indices = @transform_0, window_bounds = array<i64: 1, 8, 256>}, {transform_indices = @transform_1, window_bounds = array<i64: 8, 1>}, {transform_indices = @transform_2, window_bounds = array<i64: 8, 1>}, {transform_indices = @transform_3, window_bounds = array<i64: 1, 8, 256>}]} {
    %c0 = arith.constant 0 : index
    %c0_0 = arith.constant 0 : index
    %c0_1 = arith.constant 0 : index
    %0 = vector.load %arg2[%c0, %c0_0, %c0_1] : memref<1x8x256xf32, #tpu.memory_space<vmem>>, vector<1x8x256xf32>
    %1 = vector.shape_cast %0 : vector<1x8x256xf32> to vector<8x256xf32>
    %cst = arith.constant dense<0.000000e+00> : vector<8xf32>
    %2 = vector.multi_reduction <add>, %1, %cst [1] : vector<8x256xf32> to vector<8xf32>
    %3 = vector.shape_cast %2 : vector<8xf32> to vector<8x1xf32>
    %4 = arith.mulf %1, %1 : vector<8x256xf32>
    %cst_2 = arith.constant dense<0.000000e+00> : vector<8xf32>
    %5 = vector.multi_reduction <add>, %4, %cst_2 [1] : vector<8x256xf32> to vector<8xf32>
    %6 = vector.shape_cast %5 : vector<8xf32> to vector<8x1xf32>
    %cst_3 = arith.constant 3.906250e-03 : f32
    %7 = vector.broadcast %cst_3 : f32 to vector<8x1xf32>
    %8 = arith.mulf %3, %7 : vector<8x1xf32>
    %cst_4 = arith.constant 3.906250e-03 : f32
    %9 = vector.broadcast %cst_4 : f32 to vector<8x1xf32>
    %10 = arith.mulf %6, %9 : vector<8x1xf32>
    %11 = arith.mulf %8, %8 : vector<8x1xf32>
    %12 = arith.subf %10, %11 : vector<8x1xf32>
    %cst_5 = arith.constant 0.000000e+00 : f32
    %13 = vector.broadcast %cst_5 : f32 to vector<8x1xf32>
    %14 = arith.maximumf %12, %13 : vector<8x1xf32>
    %cst_6 = arith.constant 9.99999971E-10 : f32
    %15 = vector.broadcast %cst_6 : f32 to vector<8x1xf32>
    %16 = arith.addf %14, %15 : vector<8x1xf32>
    %17 = math.rsqrt %16 : vector<8x1xf32>
    %c0_7 = arith.constant 0 : index
    %c0_8 = arith.constant 0 : index
    %18 = vector.load %arg3[%c0_7, %c0_8] : memref<8x1xf32, #tpu.memory_space<vmem>>, vector<8x1xf32>
    %19 = arith.mulf %17, %18 : vector<8x1xf32>
    %c0_9 = arith.constant 0 : index
    %c0_10 = arith.constant 0 : index
    %20 = vector.load %arg4[%c0_9, %c0_10] : memref<8x1xf32, #tpu.memory_space<vmem>>, vector<8x1xf32>
    %21 = arith.mulf %8, %19 : vector<8x1xf32>
    %22 = arith.subf %20, %21 : vector<8x1xf32>
    %23 = vector.broadcast %19 : vector<8x1xf32> to vector<8x256xf32>
    %24 = arith.mulf %1, %23 : vector<8x256xf32>
    %25 = vector.broadcast %22 : vector<8x1xf32> to vector<8x256xf32>
    %26 = arith.addf %24, %25 : vector<8x256xf32>
    %c0_11 = arith.constant 0 : index
    %c0_12 = arith.constant 0 : index
    %c0_13 = arith.constant 0 : index
    %27 = vector.load %arg5[%c0_11, %c0_12, %c0_13] : memref<1x8x256xf32, #tpu.memory_space<vmem>>, vector<1x8x256xf32>
    %28 = vector.shape_cast %27 : vector<1x8x256xf32> to vector<8x256xf32>
    %29 = vector.shape_cast %26 : vector<8x256xf32> to vector<1x8x256xf32>
    tpu.vector_store %arg5[%c0_11, %c0_12, %c0_13], %29 {strides = array<i32>} : memref<1x8x256xf32, #tpu.memory_space<vmem>>, vector<1x8x256xf32>,
    return
  }
  func.func @transform_0(%arg0: i32, %arg1: i32) -> (i32, i32, i32) {
    %c0_i32 = arith.constant 0 : i32
    %c0_i32_0 = arith.constant 0 : i32
    return %arg1, %arg0, %c0_i32 : i32, i32, i32
  }
  func.func @transform_1(%arg0: i32, %arg1: i32) -> (i32, i32) {
    %c0_i32 = arith.constant 0 : i32
    %c0_i32_0 = arith.constant 0 : i32
    return %arg0, %c0_i32 : i32, i32
  }
  func.func @transform_2(%arg0: i32, %arg1: i32) -> (i32, i32) {
    %c0_i32 = arith.constant 0 : i32
    %c0_i32_0 = arith.constant 0 : i32
    return %arg0, %c0_i32 : i32, i32
  }
  func.func @transform_3(%arg0: i32, %arg1: i32) -> (i32, i32, i32) {
    %c0_i32 = arith.constant 0 : i32
    %c0_i32_0 = arith.constant 0 : i32
    return %arg1, %arg0, %c0_i32 : i32, i32, i32
  }
}

</mosaic_0001>

<bundles_post_ra>
// kernel: tpu_custom_call.1
= control target key start
LH: loop header
LB: loop body
LE: loop exit
PB: predicated region body
PF: predicated region fallthrough
CT: control target
= control target key end

     0   :  { %8 = vsyncpa [#allocation3], 0  ;;  %s772_s0 = inlined_call_operand.hbm [shape: f32[2,8,256], index: 0, kind: input, shape index: {}]   ;;  %s773_s1 = inlined_call_operand.vmem [shape: f32[8,1], index: 1, kind: input, shape index: {}]   ;;  %s774_s2 = inlined_call_operand.vmem [shape: f32[8,1], index: 2, kind: input, shape index: {}]   ;;  %s775_s3 = inlined_call_operand.hbm [shape: f32[2,8,256], index: 3, kind: output, shape index: {}]  }
   0x1   :  { %10 = vsyncpa [#allocation3 + $0x1], 0 }
   0x2   :  { %11 = vsyncpa [#allocation4], 0 }
   0x3   :  { %13 = vsyncpa [#allocation4 + $0x1], 0  ;;  %s642_s12 = smov 0   ;;  %s644_s13 = smov 0  }
   0x4   :  { %s646_s14 = smov 0   ;;  %s648_s15 = smov 0  }
   0x5   :  { %s650_s16 = smov 0   ;;  %s652_s17 = smov 0  }
   0x6 LB: > { %s421_s18 = sadd.s32 4294967295, %s619_s17   ;;  %s422_s19 = sadd.s32 4294967294, %s619_s17   ;;  %s619_s17 = sphi %s652_s17, %s19_s17   ;;  %s615_s16 = sphi %s650_s16, %s784_s16   ;;  %s611_s15 = sphi %s648_s15, %s783_s15   ;;  %s607_s14 = sphi %s646_s14, %s782_s14   ;;  %s603_s13 = sphi %s644_s13, %s781_s13   ;;  %s599_s12 = sphi %s642_s12, %s780_s12  }
   0x7   : > { %s28_s20 = sadd.s32 1, %s615_s16  ;;  %s40_s21 = sadd.s32 1, %s607_s14 }
   0x8   : > { %p29_p0 = scmp.ge.s32.totalorder %s28_s20, 2  ;;  %p47_p1 = scmp.ne.s32.totalorder %s607_s14, %s603_s13 }
   0x9   : > { %p48_p2 = scmp.eq.s32.totalorder %s619_s17, 0  ;;  %p53_p3 = scmp.ne.s32.totalorder %s603_s13, %s599_s12 }
   0xa   : > { %s786_s20 = smov (%p29_p0, %s28_s20), 0  ;;  %p54_p5 = scmp.eq.s32.totalorder %s421_s18, 0 }
   0xb   : > { %p683_p4 = por %p48_p2, %p47_p1  ;;  %s35_s23 = ssub.s32 %s615_s16, %s786_s20 }
   0xc   : > { %p131_p6 = scmp.eq.s32.totalorder %s421_s18, 1  ;;  %p38_p7 = scmp.eq.s32.totalorder %s35_s23, 0 }
   0xd   : > { %p689_p8 = por %p54_p5, %p53_p3  ;;  %p137_p10 = scmp.eq.s32.totalorder %s422_s19, 1 }
   0xe   : > { %p693_p9 = por %p131_p6, %p47_p1  ;;  %p426_p12 = scmp.ge.s32.totalorder %s619_s17, 2 }
   0xf   : > { %s698_s26 = scalar_select %p38_p7, %s607_s14, %s40_s21  }
  0x10   : > { %p700_p11 = por %p137_p10, %p53_p3  ;;  %p452_p13 = scmp.lt.s32.totalorder %s619_s17, 2 }
  0x11   : > { %s171_s28 = sand.u32 1, %s607_s14   ;;  %s438_s30 = sshll.u32 %s615_s16, 4 }
  0x12   : > { %s427_s29 = sshll.u32 %s171_s28, 4  ;;  %s182_s6 = scalar_lea.hbm %s772_s0, %s438_s30 }
  0x13   : > { %s175_s7 = scalar_lea.vmem [#allocation2], %s427_s29  ;;  %s184_s9 = sshll.u32 %s182_s6, 4  ;;  %s185_s9 = int_to_ptr.hbm [resolvable:$true] %s184_s9 }
  0x14   : > { %s186_s8 = sshll.u32 %s175_s7, 4  ;;  %p445_p0 = pnand %p452_p13, %p683_p4  ;;  %s187_s8 = int_to_ptr.vmem [resolvable:$true] %s186_s8 }
  0x15   : > { %p430_p1 = scmp.ge.s32.totalorder %s619_s17, 1  ;;  %p191_p2 = scmp.lt.s32.totalorder %s619_s17, 3 }
  0x16   : > { %s172_s10 = scalar_lea.sflag [#allocation3], %s171_s28 }
  0x17   : > { %447 = dma.hbm_to_vmem [thread:$0]  (!%p445_p0), %s185_s9, 256, %s187_s8, %s172_s10  }
  0x18   : > { %p192_p3 = pnand %p430_p1, %p191_p2 }
  0x19   : > { %s716_s11 = sand.u32 (!%p192_p3), 1, %s603_s13  }
  0x1a   : > { %195 = sbr.rel (%p192_p3) target bundleno = 316 (0x13c), region = 32  ;;  %s431_s18 = sshll.u32 (!%p192_p3), %s716_s11, 4 }
  0x1b   : > { %s198_s19 = scalar_lea.sflag (!%p192_p3), [#allocation3], %s716_s11  ;;  %s201_s21 = scalar_lea.vmem (!%p192_p3), [#allocation2], %s431_s18 }
  0x1f   : > { %590 = dma.done.wait (%p689_p8), %s198_s19, 256  }
  0x20   : > { %592 = vsyncadd (%p689_p8), %s198_s19, 4294967040  ;;  %v241_v0 = vld [vmem:[%s201_s21] sm:$0xff]  ;;  %v242_v1 = vld [vmem:[%s201_s21 + $0x8] sm:$0xff]  ;;  %v621_v6 = vmov 0   ;;  %s439_s29 = sshll.u32 %s611_s15, 4  ;;  %s232_s6 = scalar_lea.vmem [#allocation5], %s431_s18 }
  0x21   : > { %v243_v2 = vadd.f32 %v242_v1, %v241_v0  ;;  %v246_v3 = vmul.f32 %v241_v0, %v241_v0  ;;  %v247_v4 = vmul.f32 %v242_v1, %v242_v1  ;;  %503 = vset.pattern.permute.xlu1 %v621_v6  ;;  %504 = vset.pattern.permute.xlu0 %v621_v6  ;;  %v267_v21 = vld [vmem:[%s773_s1] sm:$0xff]  ;;  %s302_s5 = scalar_lea.hbm %s775_s3, %s439_s29  ;;  %s304_s7 = sshll.u32 %s232_s6, 4  ;;  %s305_s7 = int_to_ptr.vmem [resolvable:$true] %s304_s7 }
  0x22   : > { %v269_v25 = vld [vmem:[%s774_s2] sm:$0xff]  ;;  %s306_s8 = sshll.u32 %s302_s5, 4  ;;  %s289_s9 = scalar_lea.sflag [#allocation4], %s716_s11  ;;  %s307_s8 = int_to_ptr.hbm [resolvable:$true] %s306_s8 }
  0x23   : > { %244 = vadd.xlane.f32.xlu0 %v243_v2  ;;  %v248_v5 = vadd.f32 %v247_v4, %v246_v3  ;;  %s551_s15 = sshra.s32 %s307_s8, 4  ;;  %s557_s18 = scalar_lea.hbm %s775_s3, 32  ;;  %s552_s15 = int_to_ptr.hbm [resolvable:$true] %s551_s15 }
  0x24   : > { %s553_s10 = scalar_lea.hbm %s552_s15, 16  ;;  %p558_p7 = scmp.lt.s32.totalorder %s552_s15, %s775_s3 }
  0x25   : > { %p554_p4 = scmp.ne.s32.totalorder %s552_s15, %s553_s10  ;;  %p559_p8 = scmp.lt.s32.totalorder %s557_s18, %s553_s10 }
  0x27   : > { %p555_p5 = pnand %p554_p4, %p693_p9  ;;  %p560_p10 = por %p559_p8, %p558_p7 }
  0x29   : > { %p556_p6 = pneg %p555_p5 }
  0x2b   : > { %249 = vadd.xlane.f32.xlu0 %v248_v5  ;;  %p561_p13 = pnand %p560_p10, %p556_p6 }
  0x96   : > { %v245_v7 = vpop.xlane.xlu0 %244 }
  0x97   : > { %v251_v8 = vmul.f32 0.00390625, %v245_v7 }
  0x99   : > { %v253_v10 = vmul.f32 %v251_v8, %v251_v8 }
  0x9e   : > { %v250_v9 = vpop.xlane.xlu0 %249 }
  0x9f   : > { %v252_v11 = vmul.f32 0.00390625, %v250_v9 }
  0xa1   : > { %v254_v12 = vsub.f32 %v252_v11, %v253_v10 }
  0xa3   : > { %v255_v13 = vmax.f32 %v254_v12, 0.0 }
  0xa5   : > { %v256_v14 = vadd.f32 1e-09, %v255_v13 }
  0xa7   : > { %505 = vrsqrt.f32 %v256_v14  ;;  %vm263_vm1 = vweird.f32 %v256_v14 }
  0xad   : > { %v506_v15 = vpop.eup %505 }
  0xae   : > { %v258_v16 = vmul.f32 %v506_v15, %v256_v14  ;;  %vm264_vm0 = vweird.f32 %v506_v15 }
  0xaf   : > { %vm265_vm2 = vmor %vm263_vm1, %vm264_vm0 }
  0xb0   : > { %v259_v17 = vmul.f32 %v506_v15, %v258_v16 }
  0xb2   : > { %v260_v18 = vmul.f32 0.5, %v259_v17 }
  0xb4   : > { %v261_v19 = vsub.f32 1.5, %v260_v18 }
  0xb6   : > { %v262_v20 = vmul.f32 %v506_v15, %v261_v19 }
  0xb8   : > { %v266_v22 = vsel %vm265_vm2, %v506_v15, %v262_v20 }
  0xb9   : > { %v268_v23 = vmul.f32 %v267_v21, %v266_v22 }
  0xbb   : > { %274 = vperm.xlu1 %503, %v268_v23   ;;  %v270_v24 = vmul.f32 %v268_v23, %v251_v8 }
  0xbd   : > { %v271_v26 = vsub.f32 %v269_v25, %v270_v24 }
  0xc3   : > { %281 = vperm.xlu1 %503, %v271_v26  }
 0x12d   : > { %v275_v27 = vpop.permute.xlu1 %274 }
 0x12e   : > { %v277_v28 = vmul.f32 %v275_v27, %v241_v0  ;;  %v278_v29 = vmul.f32 %v275_v27, %v242_v1 }
 0x135   : > { %v282_v30 = vpop.permute.xlu1 %281 }
 0x136   : > { %v284_v31 = vadd.f32 %v282_v30, %v277_v28  ;;  %v285_v32 = vadd.f32 %v282_v30, %v278_v29 }
 0x138   : > { %286 = vst [vmem:[%s232_s6] sm:$0xff] %v284_v31 }
 0x139   : > { %287 = vst [vmem:[%s232_s6 + $0x8] sm:$0xff] %v285_v32 }
 0x13a   : > { %564 = shalt.err (!%p561_p13)
}
 0x13b   : > { %442 = dma.vmem_to_hbm [thread:$0]  (%p693_p9), %s305_s7, 256, %s307_s8, %s289_s9  }
 0x13c PF: > { %s318_s11 = sand.u32 1, %s599_s12   ;;  %p449_p0 = pnand %p426_p12, %p700_p11 }
 0x13d   : > { %s319_s24 = scalar_lea.sflag [#allocation4], %s318_s11 }
 0x13e   : > { %p450_p1 = pneg %p449_p0 }
 0x140   : > { %594 = dma.done.wait (%p450_p1), %s319_s24, 256  }
 0x141   : > { %596 = vsyncadd (%p450_p1), %s319_s24, 4294967040  ;;  %s19_s17 = sadd.s32 1, %s619_s17   ;;  %s780_s12 = smov %s603_s13 }
 0x142   : > { %p16_p2 = scmp.ge.s32.totalorder %s19_s17, 4   ;;  %s781_s13 = smov %s607_s14 }
 0x143   : > { %s782_s14 = smov %s698_s26  ;;  %s783_s15 = smov %s615_s16 }
 0x144   : > { %s784_s16 = smov %s786_s20  ;;  %18 = sbr.rel (!%p16_p2) target bundleno = 6 (0x6), region = 83 }
 0x149   :  { %325 = vsyncpa [#allocation3], 1 }
 0x14a   :  { %327 = vsyncpa [#allocation3 + $0x1], 1 }
 0x14b   :  { %328 = vsyncpa [#allocation4], 1 }
 0x14c   :  { %330 = vsyncpa [#allocation4 + $0x1], 1 }

</bundles_post_ra>
